<compile_context>
chip_gen: v7x
topology: tpu7x:2x2x1
jax: 0.10.0
libtpu: 0.0.40
codegen_flags: <defaults>
</compile_context>

<pallas_src>
import functools

import numpy as np
import jax
import jax.numpy as jnp
from jax.experimental import pallas as pl
from jax.experimental.pallas import tpu as pltpu


# ---------------------------------------------------------------------------
# Kernel
# ---------------------------------------------------------------------------
def _strided_random_pool_kernel(idx_ref, x_ref, out_ref, *,
                                kernel_size, n_windows, padding):
    # idx_ref: (Bt, 1, Np) int32 — random slot choice per (batch, window)
    # x_ref:   (Bt, Ft, S)       — unpadded input block
    # out_ref: (Bt, Ft, Np)      — pooled output block (Np >= n_windows)
    Bt, Ft, S = x_ref.shape
    Np = out_ref.shape[-1]

    idx = idx_ref[...]          # (Bt, 1, Np)
    x = x_ref[...]              # (Bt, Ft, S), native dtype (no f32 cast)

    acc = jnp.zeros((Bt, Ft, Np), dtype=x.dtype)
    # kernel_size is small and static -> fully unrolled, pure VPU selects.
    for r in range(kernel_size):
        # Window r covers padded positions r*n_windows + [0, Np); in unpadded
        # coordinates that is start = r*n_windows - padding.  Edge lanes that
        # fall outside [0, S) are the zero padding -> filled with zeros here,
        # so no padded copy of x is ever written to / read from HBM.
        start = r * n_windows - padding
        stop = start + Np
        lo = min(max(start, 0), S)
        hi = max(min(stop, S), lo)
        width = hi - lo
        if width <= 0:
            win = jnp.zeros((Bt, Ft, Np), dtype=x.dtype)
        else:
            left = lo - start               # zero lanes before (r == 0 edge)
            right = Np - left - width       # zero lanes after  (r == k-1 edge)
            pieces = []
            if left:
                pieces.append(jnp.zeros((Bt, Ft, left), dtype=x.dtype))
            pieces.append(x[:, :, lo:hi])
            if right:
                pieces.append(jnp.zeros((Bt, Ft, right), dtype=x.dtype))
            win = pieces[0] if len(pieces) == 1 else jnp.concatenate(pieces, axis=-1)
        acc = jnp.where(idx == r, win, acc)

    out_ref[...] = acc


# ---------------------------------------------------------------------------
# Block-size selection from an explicit VMEM budget
# ---------------------------------------------------------------------------
_VMEM_BLOCK_BUDGET = 24 * 1024 * 1024   # working set target (double-buffered)
_VMEM_LIMIT_BYTES = 48 * 1024 * 1024    # scoped limit: fits v7x 64MiB, > v5e 16MiB default


def _pick_sublane_tile(F, cap):
    """Largest divisor of F that is a multiple of 8 and <= cap, else full F."""
    cands = [d for d in range(8, min(F, max(cap, 1)) + 1, 8) if F % d == 0]
    if cands:
        return cands[-1]
    return F            # full dim is always a legal block shape


def _pick_batch_tile(B, cap):
    cap = max(1, min(B, cap))
    for d in range(cap, 0, -1):
        if B % d == 0:
            return d
    return 1


def _choose_blocks(B, F, S, n_out, itemsize, budget=_VMEM_BLOCK_BUDGET):
    # Per (b, f) row: double-buffered x row + double-buffered out row
    # + ~4 select intermediates (acc / window / mask), conservatively f32.
    per_row = 2 * S * itemsize + 2 * n_out * itemsize + 4 * n_out * 4 + 64
    max_rows = max(1, budget // per_row)

    block_f = _pick_sublane_tile(F, max_rows)
    block_b = _pick_batch_tile(B, max(1, max_rows // block_f))

    # Keep >= 2 parallel grid steps when possible so both v7x TensorCores work.
    if (B // block_b) * (F // block_f) < 2:
        if B >= 2:
            block_b = _pick_batch_tile(B, B // 2)
        elif F >= 16:
            smaller = [d for d in range(8, block_f // 2 + 1, 8) if F % d == 0]
            if smaller:
                block_f = smaller[-1]
    return block_b, block_f


def _padded_lane_count(n_windows):
    """Pad output lanes to a multiple of 128 only when the overhead is <=12.5%."""
    rounded = ((n_windows + 127) // 128) * 128
    if rounded != n_windows and (rounded - n_windows) * 8 <= n_windows:
        return rounded
    return n_windows


# ---------------------------------------------------------------------------
# Wrappers
# ---------------------------------------------------------------------------
def strided_random_pool_with_idx(x, idx, kernel_size, padding):
    """x: [B, F, S], idx: [B, n_windows] int  ->  [B, F, n_windows]."""
    B, F_dim, S = x.shape
    L = S + 2 * padding
    assert L % kernel_size == 0, (
        "padded seq_len must be divisible by kernel_size (PyTorch .view requirement)")
    n_windows = L // kernel_size
    assert idx.shape == (B, n_windows)

    itemsize = jnp.dtype(x.dtype).itemsize
    n_out = _padded_lane_count(n_windows)           # lane-dense stores when cheap
    block_b, block_f = _choose_blocks(B, F_dim, S, n_out, itemsize)

    idx3 = idx.astype(jnp.int32).reshape(B, 1, n_windows)
    if n_out != n_windows:
        idx3 = jnp.pad(idx3, ((0, 0), (0, 0), (0, n_out - n_windows)))

    # Memory-bound gather: ~kernel_size compares/selects per output element.
    cost = pl.CostEstimate(
        flops=kernel_size * B * F_dim * n_out,
        transcendentals=0,
        bytes_accessed=(x.size * itemsize
                        + idx3.size * 4
                        + B * F_dim * n_out * itemsize),
    )

    out = pl.pallas_call(
        functools.partial(_strided_random_pool_kernel,
                          kernel_size=kernel_size,
                          n_windows=n_windows,
                          padding=padding),
        out_shape=jax.ShapeDtypeStruct((B, F_dim, n_out), x.dtype),
        grid=(B // block_b, F_dim // block_f),
        in_specs=[
            pl.BlockSpec((block_b, 1, n_out), lambda b, f: (b, 0, 0)),
            pl.BlockSpec((block_b, block_f, S), lambda b, f: (b, f, 0)),
        ],
        out_specs=pl.BlockSpec((block_b, block_f, n_out), lambda b, f: (b, f, 0)),
        compiler_params=pltpu.CompilerParams(
            dimension_semantics=("parallel", "parallel"),
            vmem_limit_bytes=_VMEM_LIMIT_BYTES,
        ),
        cost_estimate=cost,
    )(idx3, x)

    if n_out != n_windows:
        out = out[:, :, :n_windows]
    return out


def strided_random_pool(x, key, kernel_size=5, padding=0):
    """Full forward matching StridedRandomPool: draws idx from `key` internally."""
    B, _, S = x.shape
    n_windows = (S + 2 * padding) // kernel_size
    idx = jax.random.randint(key, (B, n_windows), 0, kernel_size, dtype=jnp.int32)
    return strided_random_pool_with_idx(x, idx, kernel_size, padding)


# ---------------------------------------------------------------------------
# Reference & test
# ---------------------------------------------------------------------------
def _reference_numpy(x, idx, kernel_size, padding):
    """Pure-numpy mirror of the PyTorch forward (given the same idx)."""
    x = np.asarray(x)
    B, F_dim, S = x.shape
    pad = np.zeros((B, F_dim, padding), dtype=x.dtype)
    xp = np.concatenate([pad, x, pad], axis=2)                  # (B, F, L)
    xr = xp.reshape(B, F_dim, kernel_size, -1)                  # (B, F, k, n_windows)
    n_windows = xr.shape[-1]
    out = np.empty((B, F_dim, n_windows), dtype=x.dtype)
    for b in range(B):
        for j in range(n_windows):
            out[b, :, j] = xr[b, :, idx[b, j], j]
    return out


if __name__ == "__main__":
    B, F_dim, S = 2, 32, 16
    KERNEL_SIZE, PADDING = 5, 2            # padded length 20 -> 4 windows

    key = jax.random.PRNGKey(0)
    kx, kidx = jax.random.split(key)
    x = jax.random.normal(kx, (B, F_dim, S), dtype=jnp.float32)

    n_windows = (S + 2 * PADDING) // KERNEL_SIZE
    idx = jax.random.randint(kidx, (B, n_windows), 0, KERNEL_SIZE, dtype=jnp.int32)

    out = strided_random_pool_with_idx(x, idx, KERNEL_SIZE, PADDING)
    out = jax.block_until_ready(out)

    ref = _reference_numpy(np.asarray(x), np.asarray(idx), KERNEL_SIZE, PADDING)
    np.testing.assert_allclose(np.asarray(out), ref, rtol=1e-6, atol=1e-6)

    print("KERNEL_OK")
</pallas_src>

<mosaic_0001>
module attributes {stable_mosaic.version = 11 : i64} {
  func.func @_strided_random_pool_kernel(%arg0: i32, %arg1: i32, %arg2: memref<1x1x4xi32, #tpu.memory_space<vmem>>, %arg3: memref<1x32x16xf32, #tpu.memory_space<vmem>>, %arg4: memref<1x32x4xf32, #tpu.memory_space<vmem>>) attributes {dimension_semantics = [#tpu.dimension_semantics<parallel>, #tpu.dimension_semantics<parallel>], iteration_bounds = array<i64: 2, 1>, scalar_prefetch = 0 : i64, scratch_operands = 0 : i64, tpu.core_type = #tpu.core_type<tc>, window_params = [{transform_indices = @transform_0, window_bounds = array<i64: 1, 1, 4>}, {transform_indices = @transform_1, window_bounds = array<i64: 1, 32, 16>}, {transform_indices = @transform_2, window_bounds = array<i64: 1, 32, 4>}]} {
    %c0 = arith.constant 0 : index
    %c0_0 = arith.constant 0 : index
    %c0_1 = arith.constant 0 : index
    %0 = vector.load %arg2[%c0, %c0_0, %c0_1] : memref<1x1x4xi32, #tpu.memory_space<vmem>>, vector<1x1x4xi32>
    %c0_2 = arith.constant 0 : index
    %c0_3 = arith.constant 0 : index
    %c0_4 = arith.constant 0 : index
    %1 = vector.load %arg3[%c0_2, %c0_3, %c0_4] : memref<1x32x16xf32, #tpu.memory_space<vmem>>, vector<1x32x16xf32>
    %cst = arith.constant 0.000000e+00 : f32
    %2 = vector.broadcast %cst : f32 to vector<1x32x4xf32>
    %cst_5 = arith.constant 0.000000e+00 : f32
    %3 = vector.broadcast %cst_5 : f32 to vector<1x32x2xf32>
    %4 = vector.extract_strided_slice %1 {offsets = [0, 0, 0], sizes = [1, 32, 2], strides = [1, 1, 1]} : vector<1x32x16xf32> to vector<1x32x2xf32>
    %5 = tpu.concatenate %3, %4 in 2 : vector<1x32x2xf32>, vector<1x32x2xf32> -> vector<1x32x4xf32>
    %c0_i32 = arith.constant 0 : i32
    %6 = vector.broadcast %c0_i32 : i32 to vector<1x1x4xi32>
    %7 = arith.cmpi eq, %0, %6 : vector<1x1x4xi32>
    %8 = vector.shape_cast %7 : vector<1x1x4xi1> to vector<1x1x4xi1>
    %9 = vector.broadcast %8 : vector<1x1x4xi1> to vector<1x32x4xi1>
    %10 = arith.select %9, %5, %2 : vector<1x32x4xi1>, vector<1x32x4xf32>
    %11 = vector.extract_strided_slice %1 {offsets = [0, 0, 2], sizes = [1, 32, 4], strides = [1, 1, 1]} : vector<1x32x16xf32> to vector<1x32x4xf32>
    %c1_i32 = arith.constant 1 : i32
    %12 = vector.broadcast %c1_i32 : i32 to vector<1x1x4xi32>
    %13 = arith.cmpi eq, %0, %12 : vector<1x1x4xi32>
    %14 = vector.shape_cast %13 : vector<1x1x4xi1> to vector<1x1x4xi1>
    %15 = vector.broadcast %14 : vector<1x1x4xi1> to vector<1x32x4xi1>
    %16 = arith.select %15, %11, %10 : vector<1x32x4xi1>, vector<1x32x4xf32>
    %17 = vector.extract_strided_slice %1 {offsets = [0, 0, 6], sizes = [1, 32, 4], strides = [1, 1, 1]} : vector<1x32x16xf32> to vector<1x32x4xf32>
    %c2_i32 = arith.constant 2 : i32
    %18 = vector.broadcast %c2_i32 : i32 to vector<1x1x4xi32>
    %19 = arith.cmpi eq, %0, %18 : vector<1x1x4xi32>
    %20 = vector.shape_cast %19 : vector<1x1x4xi1> to vector<1x1x4xi1>
    %21 = vector.broadcast %20 : vector<1x1x4xi1> to vector<1x32x4xi1>
    %22 = arith.select %21, %17, %16 : vector<1x32x4xi1>, vector<1x32x4xf32>
    %23 = vector.extract_strided_slice %1 {offsets = [0, 0, 10], sizes = [1, 32, 4], strides = [1, 1, 1]} : vector<1x32x16xf32> to vector<1x32x4xf32>
    %c3_i32 = arith.constant 3 : i32
    %24 = vector.broadcast %c3_i32 : i32 to vector<1x1x4xi32>
    %25 = arith.cmpi eq, %0, %24 : vector<1x1x4xi32>
    %26 = vector.shape_cast %25 : vector<1x1x4xi1> to vector<1x1x4xi1>
    %27 = vector.broadcast %26 : vector<1x1x4xi1> to vector<1x32x4xi1>
    %28 = arith.select %27, %23, %22 : vector<1x32x4xi1>, vector<1x32x4xf32>
    %29 = vector.extract_strided_slice %1 {offsets = [0, 0, 14], sizes = [1, 32, 2], strides = [1, 1, 1]} : vector<1x32x16xf32> to vector<1x32x2xf32>
    %cst_6 = arith.constant 0.000000e+00 : f32
    %30 = vector.broadcast %cst_6 : f32 to vector<1x32x2xf32>
    %31 = tpu.concatenate %29, %30 in 2 : vector<1x32x2xf32>, vector<1x32x2xf32> -> vector<1x32x4xf32>
    %c4_i32 = arith.constant 4 : i32
    %32 = vector.broadcast %c4_i32 : i32 to vector<1x1x4xi32>
    %33 = arith.cmpi eq, %0, %32 : vector<1x1x4xi32>
    %34 = vector.shape_cast %33 : vector<1x1x4xi1> to vector<1x1x4xi1>
    %35 = vector.broadcast %34 : vector<1x1x4xi1> to vector<1x32x4xi1>
    %36 = arith.select %35, %31, %28 : vector<1x32x4xi1>, vector<1x32x4xf32>
    %c0_7 = arith.constant 0 : index
    %c0_8 = arith.constant 0 : index
    %c0_9 = arith.constant 0 : index
    %37 = vector.load %arg4[%c0_7, %c0_8, %c0_9] : memref<1x32x4xf32, #tpu.memory_space<vmem>>, vector<1x32x4xf32>
    tpu.vector_store %arg4[%c0_7, %c0_8, %c0_9], %36 {strides = array<i32>} : memref<1x32x4xf32, #tpu.memory_space<vmem>>, vector<1x32x4xf32>,
    return
  }
  func.func @transform_0(%arg0: i32, %arg1: i32) -> (i32, i32, i32) {
    %c0_i32 = arith.constant 0 : i32
    %c0_i32_0 = arith.constant 0 : i32
    %c0_i32_1 = arith.constant 0 : i32
    return %arg0, %c0_i32, %c0_i32_0 : i32, i32, i32
  }
  func.func @transform_1(%arg0: i32, %arg1: i32) -> (i32, i32, i32) {
    %c0_i32 = arith.constant 0 : i32
    %c0_i32_0 = arith.constant 0 : i32
    return %arg0, %arg1, %c0_i32 : i32, i32, i32
  }
  func.func @transform_2(%arg0: i32, %arg1: i32) -> (i32, i32, i32) {
    %c0_i32 = arith.constant 0 : i32
    %c0_i32_0 = arith.constant 0 : i32
    return %arg0, %arg1, %c0_i32 : i32, i32, i32
  }
}

</mosaic_0001>

<bundles_post_ra>
// kernel: tpu_custom_call.1
= control target key start
LH: loop header
LB: loop body
LE: loop exit
PB: predicated region body
PF: predicated region fallthrough
CT: control target
= control target key end

     0   :  { %s519_s9 = smov 0   ;;  %s521_s10 = smov 0   ;;  %s635_s0 = inlined_call_operand.vmem [shape: s32[2,1,4], index: 0, kind: input, shape index: {}]   ;;  %s636_s1 = inlined_call_operand.vmem [shape: f32[2,32,16], index: 1, kind: input, shape index: {}]   ;;  %s637_s2 = inlined_call_operand.vmem [shape: f32[2,32,4], index: 2, kind: output, shape index: {}]  }
   0x1   :  { %s523_s11 = smov 0  }
   0x2 LB: > { %s24_s12 = sadd.s32 1, %s492_s10  ;;  %p435_p0 = scmp.ge.s32.totalorder %s496_s11, 1  ;;  %s496_s11 = sphi %s523_s11, %s12_s11   ;;  %s492_s10 = sphi %s521_s10, %s649_s10   ;;  %s488_s9 = sphi %s519_s9, %s648_s9  }
   0x3   : > { %p26_p1 = scmp.ge.s32.totalorder %s24_s12, 2  ;;  %p141_p2 = scmp.lt.s32.totalorder %s496_s11, 3 }
   0x5   : > { %s651_s12 = smov (%p26_p1, %s24_s12), 0  ;;  %p142_p3 = pnand %p435_p0, %p141_p2 }
   0x6   : > { %p174_p4 = scmp.lt.s32.totalorder (!%p142_p3), %s488_s9, 1  ;;  %s498_s17 = smov (!%p142_p3), 2   ;;  %v225_v10 = vlaneseq (!%p142_p3)  ;;  %v503_v18 = vmov (!%p142_p3), 0   ;;  %vm218_vm5 = vcmask (!%p142_p3), 15360   ;;  %vm330_vm11 = vcmask (!%p142_p3), 31744  }
   0x7   : > { %145 = sbr.rel (%p142_p3) target bundleno = 172 (0xac), region = 28  ;;  %s499_s18 = smov (!%p142_p3), 126  }
   0x8   : > { %s500_s19 = smov (!%p142_p3), 122   ;;  %s501_s20 = smov (!%p142_p3), 118   ;;  %v226_v14 = vshrl.u32 (!%p142_p3), %v225_v10, 7 }
   0x9   : > { %s502_s21 = smov (!%p142_p3), 114  }
   0xa   : > { %v227_v17 = vsub.s32 (!%p142_p3), 0, %v226_v14 }
   0xe   : > { %s653_s9 = smov (!%p174_p4, %s488_s9), 1 }
   0xf   : > { %s442_s13 = sshll.u32 %s653_s9, 5  ;;  %s176_s24 = scalar_lea.vmem %s635_s0, %s653_s9 }
  0x10   : > { %s185_s16 = scalar_lea.vmem %s636_s1, %s442_s13  ;;  %v197_v13 = vld [vmem:[%s176_s24] sm:$0x1]  ;;  %s195_s27 = scalar_lea.vmem %s637_s2, %s442_s13 }
  0x11   : > { %v200_v0 = vld [vmem:[%s185_s16 + $0x10] sm:$0xff]  ;;  %v198_v1 = vld [vmem:[%s185_s16] sm:$0xff]  ;;  %v201_v2 = vld [vmem:[%s185_s16 + $0x18] sm:$0xff]  ;;  %vm223_vm0 = vcmp.eq.s32.totalorder %v197_v13, 0  ;;  %vm234_vm1 = vcmp.eq.s32.totalorder %v197_v13, 1  ;;  %vm257_vm2 = vcmp.eq.s32.totalorder %v197_v13, 2 }
  0x12   : > { %210 = vrot.lane.b32.xlu1 %v200_v0, %s498_s17  ;;  %206 = vrot.lane.b32.xlu0 %v198_v1, %s498_s17  ;;  %v199_v3 = vld [vmem:[%s185_s16 + $0x8] sm:$0xff]  ;;  %v224_v19 = vsel %vm223_vm0, 1, %v503_v18  ;;  %vm280_vm3 = vcmp.eq.s32.totalorder %v197_v13, 3  ;;  %vm319_vm4 = vcmp.eq.s32.totalorder %v197_v13, 4  ;;  %v235_v22 = vsel %vm234_vm1, 1, %v503_v18 }
  0x13   : > { %v258_v23 = vsel %vm257_vm2, 1, %v503_v18  ;;  %v228_v24 = vrot.slane %v224_v19, %v227_v17  ;;  %v281_v25 = vsel %vm280_vm3, 1, %v503_v18  ;;  %v320_v26 = vsel %vm319_vm4, 1, %v503_v18 }
  0x14   : > { %v239_v27 = vrot.slane %v235_v22, %v227_v17  ;;  %v262_v30 = vrot.slane %v258_v23, %v227_v17  ;;  %v285_v31 = vrot.slane %v281_v25, %v227_v17  ;;  %v324_v32 = vrot.slane %v320_v26, %v227_v17 }
  0x15   : > { %vm549_vm6 = vcmp.eq.s32.totalorder %v228_v24, 1 }
  0x16   : > { %212 = vrot.lane.b32.xlu1 %v201_v2, %s498_s17  ;;  %208 = vrot.lane.b32.xlu0 %v199_v3, %s498_s17  ;;  %vm555_vm7 = vcmp.eq.s32.totalorder %v239_v27, 1  ;;  %vm559_vm8 = vcmp.eq.s32.totalorder %v262_v30, 1  ;;  %vm567_vm9 = vcmp.eq.s32.totalorder %v285_v31, 1  ;;  %vm571_vm10 = vcmp.eq.s32.totalorder %v324_v32, 1 }
  0x1a   : > { %243 = vrot.lane.b32.xlu1 %v199_v3, %s499_s18  ;;  %241 = vrot.lane.b32.xlu0 %v198_v1, %s499_s18 }
  0x1e   : > { %247 = vrot.lane.b32.xlu1 %v201_v2, %s499_s18  ;;  %245 = vrot.lane.b32.xlu0 %v200_v0, %s499_s18 }
  0x22   : > { %266 = vrot.lane.b32.xlu1 %v199_v3, %s500_s19  ;;  %264 = vrot.lane.b32.xlu0 %v198_v1, %s500_s19 }
  0x26   : > { %270 = vrot.lane.b32.xlu1 %v201_v2, %s500_s19  ;;  %268 = vrot.lane.b32.xlu0 %v200_v0, %s500_s19 }
  0x2a   : > { %289 = vrot.lane.b32.xlu1 %v199_v3, %s501_s20  ;;  %287 = vrot.lane.b32.xlu0 %v198_v1, %s501_s20 }
  0x2e   : > { %293 = vrot.lane.b32.xlu1 %v201_v2, %s501_s20  ;;  %291 = vrot.lane.b32.xlu0 %v200_v0, %s501_s20 }
  0x32   : > { %305 = vrot.lane.b32.xlu1 %v199_v3, %s502_s21  ;;  %303 = vrot.lane.b32.xlu0 %v198_v1, %s502_s21 }
  0x36   : > { %309 = vrot.lane.b32.xlu1 %v201_v2, %s502_s21  ;;  %307 = vrot.lane.b32.xlu0 %v200_v0, %s502_s21 }
  0x84   : > { %v211_v4 = vpop.permute.xlu1 %210  ;;  %v207_v5 = vpop.permute.xlu0 %206 }
  0x85   : > { %v219_v34 = vsel %vm218_vm5, 0.0, %v207_v5  ;;  %v221_v44 = vsel %vm218_vm5, 0.0, %v211_v4 }
  0x86   : > { %v230_v40 = vsel %vm549_vm6, %v219_v34, 0.0  ;;  %v232_v56 = vsel %vm549_vm6, %v221_v44, 0.0 }
  0x88   : > { %v213_v6 = vpop.permute.xlu1 %212  ;;  %v209_v7 = vpop.permute.xlu0 %208 }
  0x89   : > { %v220_v35 = vsel %vm218_vm5, 0.0, %v209_v7  ;;  %v222_v45 = vsel %vm218_vm5, 0.0, %v213_v6 }
  0x8a   : > { %v231_v41 = vsel %vm549_vm6, %v220_v35, 0.0  ;;  %v233_v57 = vsel %vm549_vm6, %v222_v45, 0.0 }
  0x8c   : > { %v244_v8 = vpop.permute.xlu1 %243  ;;  %v242_v9 = vpop.permute.xlu0 %241 }
  0x8d   : > { %v254_v46 = vsel %vm555_vm7, %v244_v8, %v231_v41  ;;  %v253_v47 = vsel %vm555_vm7, %v242_v9, %v230_v40 }
  0x90   : > { %v248_v11 = vpop.permute.xlu1 %247  ;;  %v246_v12 = vpop.permute.xlu0 %245 }
  0x91   : > { %v256_v60 = vsel %vm555_vm7, %v248_v11, %v233_v57  ;;  %v255_v61 = vsel %vm555_vm7, %v246_v12, %v232_v56 }
  0x94   : > { %v267_v15 = vpop.permute.xlu1 %266  ;;  %v265_v16 = vpop.permute.xlu0 %264 }
  0x95   : > { %v277_v48 = vsel %vm559_vm8, %v267_v15, %v254_v46  ;;  %v276_v49 = vsel %vm559_vm8, %v265_v16, %v253_v47 }
  0x98   : > { %v271_v20 = vpop.permute.xlu1 %270  ;;  %v269_v21 = vpop.permute.xlu0 %268 }
  0x99   : > { %v279_v62 = vsel %vm559_vm8, %v271_v20, %v256_v60  ;;  %v278_v63 = vsel %vm559_vm8, %v269_v21, %v255_v61 }
  0x9c   : > { %v290_v28 = vpop.permute.xlu1 %289  ;;  %v288_v29 = vpop.permute.xlu0 %287 }
  0x9d   : > { %v300_v52 = vsel %vm567_vm9, %v290_v28, %v277_v48  ;;  %v299_v53 = vsel %vm567_vm9, %v288_v29, %v276_v49 }
  0xa0   : > { %v294_v37 = vpop.permute.xlu1 %293  ;;  %v292_v38 = vpop.permute.xlu0 %291 }
  0xa1   : > { %v302_v2 = vsel %vm567_vm9, %v294_v37, %v279_v62  ;;  %v301_v3 = vsel %vm567_vm9, %v292_v38, %v278_v63 }
  0xa4   : > { %v306_v50 = vpop.permute.xlu1 %305  ;;  %v304_v51 = vpop.permute.xlu0 %303 }
  0xa5   : > { %v316_v54 = vsel %vm218_vm5, %v306_v50, 0.0  ;;  %v315_v55 = vsel %vm218_vm5, %v304_v51, 0.0 }
  0xa6   : > { %v327_v58 = vsel %vm571_vm10, %v316_v54, %v300_v52  ;;  %v326_v59 = vsel %vm571_vm10, %v315_v55, %v299_v53 }
  0xa7   : > { %332 = vst.msk [vmem:[%s195_s27 + $0x8] sm:$0xff] %vm330_vm11, %v327_v58  ;;  %331 = vst.msk [vmem:[%s195_s27] sm:$0xff] %vm330_vm11, %v326_v59 }
  0xa8   : > { %v310_v0 = vpop.permute.xlu1 %309  ;;  %v308_v1 = vpop.permute.xlu0 %307 }
  0xa9   : > { %v318_v4 = vsel %vm218_vm5, %v310_v0, 0.0  ;;  %v317_v5 = vsel %vm218_vm5, %v308_v1, 0.0 }
  0xaa   : > { %v329_v6 = vsel %vm571_vm10, %v318_v4, %v302_v2  ;;  %v328_v7 = vsel %vm571_vm10, %v317_v5, %v301_v3 }
  0xab   : > { %334 = vst.msk [vmem:[%s195_s27 + $0x18] sm:$0xff] %vm330_vm11, %v329_v6  ;;  %333 = vst.msk [vmem:[%s195_s27 + $0x10] sm:$0xff] %vm330_vm11, %v328_v7 }
  0xac PF: > { %s12_s11 = sadd.s32 1, %s496_s11   ;;  %s648_s9 = smov %s492_s10 }
  0xad   : > { %p9_p5 = scmp.ge.s32.totalorder %s12_s11, 4   ;;  %s649_s10 = smov %s651_s12 }
  0xaf   :  { %11 = sbr.rel (!%p9_p5) target bundleno = 2 (0x2), region = 61 }

</bundles_post_ra>
